<compile_context>
chip_gen: v6e
topology: v6e:2x2x1
jax: 0.10.0
libtpu: 0.0.40
codegen_flags: <defaults>
</compile_context>

<pallas_src>
import math

import jax
import jax.numpy as jnp
from jax.experimental import pallas as pl
from jax.experimental.pallas import tpu as pltpu

_SUB_CHUNK = 512  # compute sub-chunk (tokens) inside one DMA tile


def _cast(x, dt):
    return x if x.dtype == dt else x.astype(dt)


def _clustering_kernel(keys_ref, values_ref, mrow_ref, mcol_ref, cnorm_ref,
                       cscale_ref, cc_ref, cv_ref, asn_ref,
                       key_acc, val_acc, cnt_acc):
    si = pl.program_id(1)

    @pl.when(si == 0)
    def _():
        key_acc[...] = jnp.zeros_like(key_acc)
        val_acc[...] = jnp.zeros_like(val_acc)
        cnt_acc[...] = jnp.zeros_like(cnt_acc)

    c_norm = cnorm_ref[...]                       # [C, Dk] f32 (resident)
    c_mm = _cast(c_norm, keys_ref.dtype)          # MXU operand in native dtype
    C = c_norm.shape[0]
    ts = keys_ref.shape[1]

    key_sum = jnp.zeros(key_acc.shape, jnp.float32)
    val_sum = jnp.zeros(val_acc.shape, jnp.float32)
    cnt_sum = jnp.zeros(cnt_acc.shape, jnp.float32)

    # Static sub-chunk loop: keeps [C, sub] temporaries vreg-sized while the
    # HBM/DMA tile stays large.  Static slice starts are 512-aligned.
    off = 0
    while off < ts:
        sub = min(_SUB_CHUNK, ts - off)
        keys_c = keys_ref[0, off:off + sub, :]            # [sub, Dk] native dtype
        vals_c = values_ref[0, off:off + sub, :]          # [sub, Dv]
        valid_row = mrow_ref[0, :, off:off + sub] > 0.0   # [1, sub] lane-dense
        valid_col = mcol_ref[0, off:off + sub, :] > 0.0   # [sub, 1]

        # Select (not multiply) so NaN/Inf garbage from a ragged OOB tail can
        # never reach the matmuls (0 * NaN = NaN; select is safe).
        keys_c = jnp.where(valid_col, keys_c, jnp.zeros((), keys_c.dtype))
        vals_c = jnp.where(valid_col, vals_c, jnp.zeros((), vals_c.dtype))

        # Cosine-sim argmax is invariant to the positive per-key norm -> skip
        # normalizing keys.  Contract feature dims so sim lands in [C, sub].
        sim_t = jax.lax.dot_general(
            c_mm, keys_c, (((1,), (1,)), ((), ())),
            preferred_element_type=jnp.float32)            # [C, sub]

        row_c = jax.lax.broadcasted_iota(jnp.int32, (C, sub), 0)
        max_sim = jnp.max(sim_t, axis=0, keepdims=True)    # [1, sub]
        # first-occurrence argmax along the sublane (cluster) axis
        idx_f = jnp.min(jnp.where(sim_t == max_sim,
                                  row_c.astype(jnp.float32),
                                  jnp.float32(C)),
                        axis=0, keepdims=True)             # [1, sub]
        idx_row = idx_f.astype(jnp.int32)                  # [1, sub]

        # masked / out-of-bounds tokens -> cluster 0 (torch argmax of -inf row)
        asn_ref[0, :, off:off + sub] = jnp.where(valid_row, idx_row, 0)

        onehot = jnp.where((idx_row == row_c) & valid_row, 1.0, 0.0)  # [C,sub] f32
        key_sum = key_sum + jnp.dot(_cast(onehot, keys_c.dtype), keys_c,
                                    preferred_element_type=jnp.float32)
        val_sum = val_sum + jnp.dot(_cast(onehot, vals_c.dtype), vals_c,
                                    preferred_element_type=jnp.float32)
        cnt_sum = cnt_sum + jnp.sum(onehot, axis=1, keepdims=True)     # [C, 1]
        off += sub

    key_acc[...] += key_sum
    val_acc[...] += val_sum
    cnt_acc[...] += cnt_sum

    @pl.when(si == pl.num_programs(1) - 1)
    def _():
        counts = cnt_acc[...]
        nonempty = counts > 0.0
        inv = jnp.where(nonempty, 1.0 / jnp.maximum(counts, 1.0), 0.0)
        raw_cent = cnorm_ref[...] * cscale_ref[...]   # reconstruct raw centroids
        cc_ref[0] = jnp.where(nonempty, key_acc[...] * inv, raw_cent)
        cv_ref[0] = jnp.where(nonempty, val_acc[...] * inv, 0.0)


def _pick_seq_tile(S, Dk, Dv, itemsize, target_bytes=4 << 20):
    """Pick a sequence tile moving ~target_bytes of keys+values per grid step."""
    bytes_per_tok = max((Dk + Dv) * itemsize, 1)
    t = target_bytes // bytes_per_tok
    return int(max(512, min(8192, (t // 512) * 512)))


def clustering_forward(keys, values, mask, centroids, *, seq_tile=None):
    """Pallas implementation of ClusteringLayer.forward."""
    B, S, Dk = keys.shape
    Dv = values.shape[-1]
    C = centroids.shape[0]

    # keys/values stay in their native dtype (HBM-bound: no wrapper up-cast).
    centroids = centroids.astype(jnp.float32)

    ksz = jnp.dtype(keys.dtype).itemsize
    vsz = jnp.dtype(values.dtype).itemsize

    if seq_tile is None:
        ts = _pick_seq_tile(S, Dk, Dv, max(ksz, vsz))
    else:
        ts = int(seq_tile)
    if ts >= S:
        ts, n_s = S, 1
    else:
        ts = max(128, (ts // 128) * 128)   # interior tiles: lane/sublane aligned
        n_s = -(-S // ts)
    S_pad = n_s * ts

    # mask: padded tokens (ragged tail) are marked invalid; keys/values are NOT
    # padded - the in-kernel select neutralizes the garbage tail reads.
    if mask is None:
        mask_f = jnp.ones((B, S), jnp.float32)
    else:
        mask_f = mask.astype(jnp.float32)
    if S_pad != S:
        mask_f = jnp.pad(mask_f, ((0, 0), (0, S_pad - S)))
    mask_row = mask_f.reshape(B, 1, S_pad)     # lane-dense layout
    mask_col = mask_f.reshape(B, S_pad, 1)     # sublane-dense layout

    # F.normalize(p=2, dim=-1) on the centroids, hoisted out of the kernel.
    eps = 1e-12
    c_scale = jnp.maximum(
        jnp.sqrt(jnp.sum(centroids * centroids, axis=-1, keepdims=True)), eps)
    c_norm = centroids / c_scale

    out_shape = (
        jax.ShapeDtypeStruct((B, C, Dk), jnp.float32),
        jax.ShapeDtypeStruct((B, C, Dv), jnp.float32),
        jax.ShapeDtypeStruct((B, 1, S), jnp.int32),   # lane-dense assignments
    )

    grid_spec = pltpu.PrefetchScalarGridSpec(
        num_scalar_prefetch=0,
        grid=(B, n_s),
        in_specs=[
            pl.BlockSpec((1, ts, Dk), lambda b, s: (b, s, 0)),   # keys (native dtype)
            pl.BlockSpec((1, ts, Dv), lambda b, s: (b, s, 0)),   # values
            pl.BlockSpec((1, 1, ts), lambda b, s: (b, 0, s)),    # mask (lane-dense)
            pl.BlockSpec((1, ts, 1), lambda b, s: (b, s, 0)),    # mask (sublane-dense)
            pl.BlockSpec((C, Dk), lambda b, s: (0, 0)),          # normalized centroids
            pl.BlockSpec((C, 1), lambda b, s: (0, 0)),           # centroid norms
        ],
        out_specs=[
            pl.BlockSpec((1, C, Dk), lambda b, s: (b, 0, 0)),
            pl.BlockSpec((1, C, Dv), lambda b, s: (b, 0, 0)),
            pl.BlockSpec((1, 1, ts), lambda b, s: (b, 0, s)),
        ],
        scratch_shapes=[
            pltpu.VMEM((C, Dk), jnp.float32),   # key-sum accumulator
            pltpu.VMEM((C, Dv), jnp.float32),   # value-sum accumulator
            pltpu.VMEM((C, 1), jnp.float32),    # counts accumulator
        ],
    )

    # VMEM budget from actual block/scratch sizes (double-buffered) + slack.
    block_bytes = (ts * Dk * ksz + ts * Dv * vsz          # keys, values
                   + 3 * ts * 4                           # 2 mask layouts + asn block
                   + C * Dk * 4 + C * 4                   # c_norm + c_scale
                   + C * (Dk + Dv) * 4)                   # cc + cv output blocks
    scratch_bytes = C * (Dk + Dv + 1) * 4
    vmem_limit = int(min(100 << 20,
                         max(32 << 20, 2 * block_bytes + scratch_bytes + (4 << 20))))

    cc, cv, asn = pl.pallas_call(
        _clustering_kernel,
        out_shape=out_shape,
        grid_spec=grid_spec,
        compiler_params=pltpu.CompilerParams(
            dimension_semantics=("parallel", "arbitrary"),
            vmem_limit_bytes=vmem_limit),
    )(keys, values, mask_row, mask_col, c_norm, c_scale)

    return cc, cv, asn[:, 0, :]


def _reference(keys, values, mask, centroids):
    """Pure-JAX reference mirroring the PyTorch forward (for sanity checking)."""
    eps = 1e-12
    k_norm = keys / jnp.maximum(
        jnp.linalg.norm(keys, axis=-1, keepdims=True), eps)
    c_norm = centroids / jnp.maximum(
        jnp.linalg.norm(centroids, axis=-1, keepdims=True), eps)
    sim = jnp.einsum('bsd,cd->bsc', k_norm, c_norm)
    sim = jnp.where(mask[..., None] > 0, sim, -jnp.inf)
    asn = jnp.argmax(sim, axis=-1)
    C = centroids.shape[0]
    onehot = (asn[..., None] == jnp.arange(C)) & (mask[..., None] > 0)
    onehot = onehot.astype(jnp.float32)                      # [B, S, C]
    counts = onehot.sum(axis=1)[..., None]                   # [B, C, 1]
    key_sums = jnp.einsum('bsc,bsd->bcd', onehot, keys)
    val_sums = jnp.einsum('bsc,bsd->bcd', onehot, values)
    nonempty = counts > 0
    cc = jnp.where(nonempty, key_sums / jnp.maximum(counts, 1.0), centroids[None])
    cv = jnp.where(nonempty, val_sums / jnp.maximum(counts, 1.0), 0.0)
    return cc, cv, asn.astype(jnp.int32)


def _check(keys, values, mask, centroids, **kw):
    cc, cv, asn = clustering_forward(keys, values, mask, centroids, **kw)
    jax.block_until_ready((cc, cv, asn))
    cc_r, cv_r, asn_r = _reference(keys, values, mask, centroids)
    assert jnp.all(asn == asn_r), "assignment mismatch"
    assert jnp.allclose(cc, cc_r, atol=1e-5, rtol=1e-5), "centroid mismatch"
    assert jnp.allclose(cv, cv_r, atol=1e-5, rtol=1e-5), "value mismatch"


if __name__ == "__main__":
    root = jax.random.PRNGKey(0)

    # Case 1: tiny single-tile case (module-consistent small shapes).
    B, S, Dk, Dv, C = 2, 8, 32, 32, 4
    k_keys, k_vals, k_cent, k2_keys, k2_vals, k2_cent = jax.random.split(root, 6)
    keys = jax.random.normal(k_keys, (B, S, Dk), jnp.float32)
    values = jax.random.normal(k_vals, (B, S, Dv), jnp.float32)
    centroids = jax.random.normal(k_cent, (C, Dk), jnp.float32)
    mask = jnp.ones((B, S), jnp.float32).at[1, S - 2:].set(0.0)
    _check(keys, values, mask, centroids)

    # Case 2: multi-tile + ragged tail (exercises accumulation across sequence
    # tiles and the unpadded out-of-bounds last block).
    B2, S2 = 2, 200
    keys2 = jax.random.normal(k2_keys, (B2, S2, Dk), jnp.float32)
    values2 = jax.random.normal(k2_vals, (B2, S2, Dv), jnp.float32)
    centroids2 = jax.random.normal(k2_cent, (C, Dk), jnp.float32)
    mask2 = jnp.ones((B2, S2), jnp.float32).at[0, 190:].set(0.0)
    _check(keys2, values2, mask2, centroids2, seq_tile=128)

    print("KERNEL_OK")
</pallas_src>

<mosaic_0001>
module attributes {stable_mosaic.version = 11 : i64} {
  func.func @_clustering_kernel(%arg0: i32, %arg1: i32, %arg2: memref<1x8x32xf32, #tpu.memory_space<vmem>>, %arg3: memref<1x8x32xf32, #tpu.memory_space<vmem>>, %arg4: memref<1x1x8xf32, #tpu.memory_space<vmem>>, %arg5: memref<1x8x1xf32, #tpu.memory_space<vmem>>, %arg6: memref<4x32xf32, #tpu.memory_space<vmem>>, %arg7: memref<4x1xf32, #tpu.memory_space<vmem>>, %arg8: memref<1x4x32xf32, #tpu.memory_space<vmem>>, %arg9: memref<1x4x32xf32, #tpu.memory_space<vmem>>, %arg10: memref<1x1x8xi32, #tpu.memory_space<vmem>>, %arg11: memref<4x32xf32, #tpu.memory_space<vmem>>, %arg12: memref<4x32xf32, #tpu.memory_space<vmem>>, %arg13: memref<4x1xf32, #tpu.memory_space<vmem>>) attributes {dimension_semantics = [#tpu.dimension_semantics<parallel>, #tpu.dimension_semantics<arbitrary>], iteration_bounds = array<i64: 2, 1>, scalar_prefetch = 0 : i64, scratch_operands = 3 : i64, tpu.core_type = #tpu.core_type<tc>, window_params = [{transform_indices = @transform_0, window_bounds = array<i64: 1, 8, 32>}, {transform_indices = @transform_1, window_bounds = array<i64: 1, 8, 32>}, {transform_indices = @transform_2, window_bounds = array<i64: 1, 1, 8>}, {transform_indices = @transform_3, window_bounds = array<i64: 1, 8, 1>}, {pipeline_mode = #tpu.pipeline_mode<synchronous>, transform_indices = @transform_4, window_bounds = array<i64: 4, 32>}, {pipeline_mode = #tpu.pipeline_mode<synchronous>, transform_indices = @transform_5, window_bounds = array<i64: 4, 1>}, {transform_indices = @transform_6, window_bounds = array<i64: 1, 4, 32>}, {transform_indices = @transform_7, window_bounds = array<i64: 1, 4, 32>}, {transform_indices = @transform_8, window_bounds = array<i64: 1, 1, 8>}]} {
    %c0_i32 = arith.constant 0 : i32
    %0 = arith.cmpi eq, %arg1, %c0_i32 : i32
    %1 = arith.extui %0 : i1 to i32
    %c0_i32_0 = arith.constant 0 : i32
    %2 = arith.cmpi ne, %1, %c0_i32_0 : i32
    scf.if %2 {
      %cst_47 = arith.constant 0.000000e+00 : f32
      %70 = vector.broadcast %cst_47 : f32 to vector<4x32xf32>
      %c0_48 = arith.constant 0 : index
      %c0_49 = arith.constant 0 : index
      %71 = vector.load %arg11[%c0_48, %c0_49] : memref<4x32xf32, #tpu.memory_space<vmem>>, vector<4x32xf32>
      tpu.vector_store %arg11[%c0_48, %c0_49], %70 {strides = array<i32>} : memref<4x32xf32, #tpu.memory_space<vmem>>, vector<4x32xf32>,
      %cst_50 = arith.constant 0.000000e+00 : f32
      %72 = vector.broadcast %cst_50 : f32 to vector<4x32xf32>
      %c0_51 = arith.constant 0 : index
      %c0_52 = arith.constant 0 : index
      %73 = vector.load %arg12[%c0_51, %c0_52] : memref<4x32xf32, #tpu.memory_space<vmem>>, vector<4x32xf32>
      tpu.vector_store %arg12[%c0_51, %c0_52], %72 {strides = array<i32>} : memref<4x32xf32, #tpu.memory_space<vmem>>, vector<4x32xf32>,
      %cst_53 = arith.constant 0.000000e+00 : f32
      %74 = vector.broadcast %cst_53 : f32 to vector<4x1xf32>
      %c0_54 = arith.constant 0 : index
      %c0_55 = arith.constant 0 : index
      %75 = vector.load %arg13[%c0_54, %c0_55] : memref<4x1xf32, #tpu.memory_space<vmem>>, vector<4x1xf32>
      tpu.vector_store %arg13[%c0_54, %c0_55], %74 {strides = array<i32>} : memref<4x1xf32, #tpu.memory_space<vmem>>, vector<4x1xf32>,
    } else {
    }
    %c0 = arith.constant 0 : index
    %c0_1 = arith.constant 0 : index
    %3 = vector.load %arg6[%c0, %c0_1] : memref<4x32xf32, #tpu.memory_space<vmem>>, vector<4x32xf32>
    %cst = arith.constant 0.000000e+00 : f32
    %4 = vector.broadcast %cst : f32 to vector<4x32xf32>
    %cst_2 = arith.constant 0.000000e+00 : f32
    %5 = vector.broadcast %cst_2 : f32 to vector<4x32xf32>
    %cst_3 = arith.constant 0.000000e+00 : f32
    %6 = vector.broadcast %cst_3 : f32 to vector<4x1xf32>
    %c0_4 = arith.constant 0 : index
    %c0_5 = arith.constant 0 : index
    %c0_6 = arith.constant 0 : index
    %7 = vector.load %arg2[%c0_4, %c0_5, %c0_6] : memref<1x8x32xf32, #tpu.memory_space<vmem>>, vector<1x8x32xf32>
    %8 = vector.shape_cast %7 : vector<1x8x32xf32> to vector<8x32xf32>
    %c0_7 = arith.constant 0 : index
    %c0_8 = arith.constant 0 : index
    %c0_9 = arith.constant 0 : index
    %9 = vector.load %arg3[%c0_7, %c0_8, %c0_9] : memref<1x8x32xf32, #tpu.memory_space<vmem>>, vector<1x8x32xf32>
    %10 = vector.shape_cast %9 : vector<1x8x32xf32> to vector<8x32xf32>
    %c0_10 = arith.constant 0 : index
    %c0_11 = arith.constant 0 : index
    %c0_12 = arith.constant 0 : index
    %11 = vector.load %arg4[%c0_10, %c0_11, %c0_12] : memref<1x1x8xf32, #tpu.memory_space<vmem>>, vector<1x1x8xf32>
    %12 = vector.shape_cast %11 : vector<1x1x8xf32> to vector<1x8xf32>
    %cst_13 = arith.constant 0.000000e+00 : f32
    %13 = vector.broadcast %cst_13 : f32 to vector<1x8xf32>
    %14 = arith.cmpf ogt, %12, %13 : vector<1x8xf32>
    %c0_14 = arith.constant 0 : index
    %c0_15 = arith.constant 0 : index
    %c0_16 = arith.constant 0 : index
    %15 = vector.load %arg5[%c0_14, %c0_15, %c0_16] : memref<1x8x1xf32, #tpu.memory_space<vmem>>, vector<1x8x1xf32>
    %16 = vector.shape_cast %15 : vector<1x8x1xf32> to vector<8x1xf32>
    %cst_17 = arith.constant 0.000000e+00 : f32
    %17 = vector.broadcast %cst_17 : f32 to vector<8x1xf32>
    %18 = arith.cmpf ogt, %16, %17 : vector<8x1xf32>
    %cst_18 = arith.constant 0.000000e+00 : f32
    %19 = vector.shape_cast %18 : vector<8x1xi1> to vector<8x1xi1>
    %20 = vector.broadcast %19 : vector<8x1xi1> to vector<8x32xi1>
    %21 = vector.broadcast %cst_18 : f32 to vector<8x32xf32>
    %22 = arith.select %20, %8, %21 : vector<8x32xi1>, vector<8x32xf32>
    %cst_19 = arith.constant 0.000000e+00 : f32
    %23 = vector.shape_cast %18 : vector<8x1xi1> to vector<8x1xi1>
    %24 = vector.broadcast %23 : vector<8x1xi1> to vector<8x32xi1>
    %25 = vector.broadcast %cst_19 : f32 to vector<8x32xf32>
    %26 = arith.select %24, %10, %25 : vector<8x32xi1>, vector<8x32xf32>
    %cst_20 = arith.constant dense<0.000000e+00> : vector<4x8xf32>
    %27 = tpu.matmul %3, %22, %cst_20 {dimension_numbers = #tpu.dot_dimension_numbers<[1], [1], [0], [0], [0, 0, 1, 0], [], []>} : vector<4x32xf32>, vector<8x32xf32>, vector<4x8xf32> -> vector<4x8xf32>
    %28 = tpu.iota {dimensions = array<i32: 0>} : vector<4x8xi32>
    %cst_21 = arith.constant dense<0xFF800000> : vector<8xf32>
    %29 = vector.multi_reduction <maximumf>, %27, %cst_21 [0] : vector<4x8xf32> to vector<8xf32>
    %30 = vector.shape_cast %29 : vector<8xf32> to vector<1x8xf32>
    %31 = vector.broadcast %30 : vector<1x8xf32> to vector<4x8xf32>
    %32 = arith.cmpf oeq, %27, %31 : vector<4x8xf32>
    %33 = arith.sitofp %28 : vector<4x8xi32> to vector<4x8xf32>
    %cst_22 = arith.constant 4.000000e+00 : f32
    %34 = vector.broadcast %cst_22 : f32 to vector<4x8xf32>
    %35 = arith.select %32, %33, %34 : vector<4x8xi1>, vector<4x8xf32>
    %cst_23 = arith.constant dense<0x7F800000> : vector<8xf32>
    %36 = vector.multi_reduction <minimumf>, %35, %cst_23 [0] : vector<4x8xf32> to vector<8xf32>
    %37 = vector.shape_cast %36 : vector<8xf32> to vector<1x8xf32>
    %38 = arith.fptosi %37 : vector<1x8xf32> to vector<1x8xi32>
    %c0_i32_24 = arith.constant 0 : i32
    %39 = vector.broadcast %c0_i32_24 : i32 to vector<1x8xi32>
    %40 = arith.select %14, %38, %39 : vector<1x8xi1>, vector<1x8xi32>
    %c0_25 = arith.constant 0 : index
    %c0_26 = arith.constant 0 : index
    %c0_27 = arith.constant 0 : index
    %41 = vector.load %arg10[%c0_25, %c0_26, %c0_27] : memref<1x1x8xi32, #tpu.memory_space<vmem>>, vector<1x1x8xi32>
    %42 = vector.shape_cast %41 : vector<1x1x8xi32> to vector<1x8xi32>
    %43 = vector.shape_cast %40 : vector<1x8xi32> to vector<1x1x8xi32>
    tpu.vector_store %arg10[%c0_25, %c0_26, %c0_27], %43 {strides = array<i32>} : memref<1x1x8xi32, #tpu.memory_space<vmem>>, vector<1x1x8xi32>,
    %44 = vector.broadcast %38 : vector<1x8xi32> to vector<4x8xi32>
    %45 = arith.cmpi eq, %44, %28 : vector<4x8xi32>
    %46 = vector.broadcast %14 : vector<1x8xi1> to vector<4x8xi1>
    %47 = arith.andi %45, %46 : vector<4x8xi1>
    %cst_28 = arith.constant 1.000000e+00 : f32
    %cst_29 = arith.constant 0.000000e+00 : f32
    %48 = vector.broadcast %cst_28 : f32 to vector<4x8xf32>
    %49 = vector.broadcast %cst_29 : f32 to vector<4x8xf32>
    %50 = arith.select %47, %48, %49 : vector<4x8xi1>, vector<4x8xf32>
    %cst_30 = arith.constant dense<0.000000e+00> : vector<4x32xf32>
    %51 = tpu.matmul %50, %22, %cst_30 {dimension_numbers = #tpu.dot_dimension_numbers<[1], [0], [0], [1], [0, 0, 1, 1], [], []>} : vector<4x8xf32>, vector<8x32xf32>, vector<4x32xf32> -> vector<4x32xf32>
    %52 = arith.addf %4, %51 : vector<4x32xf32>
    %cst_31 = arith.constant dense<0.000000e+00> : vector<4x32xf32>
    %53 = tpu.matmul %50, %26, %cst_31 {dimension_numbers = #tpu.dot_dimension_numbers<[1], [0], [0], [1], [0, 0, 1, 1], [], []>} : vector<4x8xf32>, vector<8x32xf32>, vector<4x32xf32> -> vector<4x32xf32>
    %54 = arith.addf %5, %53 : vector<4x32xf32>
    %cst_32 = arith.constant dense<0.000000e+00> : vector<4xf32>
    %55 = vector.multi_reduction <add>, %50, %cst_32 [1] : vector<4x8xf32> to vector<4xf32>
    %56 = vector.shape_cast %55 : vector<4xf32> to vector<4x1xf32>
    %57 = arith.addf %6, %56 : vector<4x1xf32>
    %c0_33 = arith.constant 0 : index
    %c0_34 = arith.constant 0 : index
    %58 = vector.load %arg11[%c0_33, %c0_34] : memref<4x32xf32, #tpu.memory_space<vmem>>, vector<4x32xf32>
    %59 = arith.addf %58, %52 : vector<4x32xf32>
    %c0_35 = arith.constant 0 : index
    %c0_36 = arith.constant 0 : index
    %60 = vector.load %arg11[%c0_35, %c0_36] : memref<4x32xf32, #tpu.memory_space<vmem>>, vector<4x32xf32>
    tpu.vector_store %arg11[%c0_35, %c0_36], %59 {strides = array<i32>} : memref<4x32xf32, #tpu.memory_space<vmem>>, vector<4x32xf32>,
    %c0_37 = arith.constant 0 : index
    %c0_38 = arith.constant 0 : index
    %61 = vector.load %arg12[%c0_37, %c0_38] : memref<4x32xf32, #tpu.memory_space<vmem>>, vector<4x32xf32>
    %62 = arith.addf %61, %54 : vector<4x32xf32>
    %c0_39 = arith.constant 0 : index
    %c0_40 = arith.constant 0 : index
    %63 = vector.load %arg12[%c0_39, %c0_40] : memref<4x32xf32, #tpu.memory_space<vmem>>, vector<4x32xf32>
    tpu.vector_store %arg12[%c0_39, %c0_40], %62 {strides = array<i32>} : memref<4x32xf32, #tpu.memory_space<vmem>>, vector<4x32xf32>,
    %c0_41 = arith.constant 0 : index
    %c0_42 = arith.constant 0 : index
    %64 = vector.load %arg13[%c0_41, %c0_42] : memref<4x1xf32, #tpu.memory_space<vmem>>, vector<4x1xf32>
    %65 = arith.addf %64, %57 : vector<4x1xf32>
    %c0_43 = arith.constant 0 : index
    %c0_44 = arith.constant 0 : index
    %66 = vector.load %arg13[%c0_43, %c0_44] : memref<4x1xf32, #tpu.memory_space<vmem>>, vector<4x1xf32>
    tpu.vector_store %arg13[%c0_43, %c0_44], %65 {strides = array<i32>} : memref<4x1xf32, #tpu.memory_space<vmem>>, vector<4x1xf32>,
    %c0_i32_45 = arith.constant 0 : i32
    %67 = arith.cmpi eq, %arg1, %c0_i32_45 : i32
    %68 = arith.extui %67 : i1 to i32
    %c0_i32_46 = arith.constant 0 : i32
    %69 = arith.cmpi ne, %68, %c0_i32_46 : i32
    scf.if %69 {
      %c0_47 = arith.constant 0 : index
      %c0_48 = arith.constant 0 : index
      %70 = vector.load %arg13[%c0_47, %c0_48] : memref<4x1xf32, #tpu.memory_space<vmem>>, vector<4x1xf32>
      %cst_49 = arith.constant 0.000000e+00 : f32
      %71 = vector.broadcast %cst_49 : f32 to vector<4x1xf32>
      %72 = arith.cmpf ogt, %70, %71 : vector<4x1xf32>
      %cst_50 = arith.constant 1.000000e+00 : f32
      %73 = vector.broadcast %cst_50 : f32 to vector<4x1xf32>
      %74 = arith.maximumf %70, %73 : vector<4x1xf32>
      %cst_51 = arith.constant 1.000000e+00 : f32
      %75 = vector.broadcast %cst_51 : f32 to vector<4x1xf32>
      %76 = arith.divf %75, %74 : vector<4x1xf32>
      %cst_52 = arith.constant 0.000000e+00 : f32
      %77 = vector.broadcast %cst_52 : f32 to vector<4x1xf32>
      %78 = arith.select %72, %76, %77 : vector<4x1xi1>, vector<4x1xf32>
      %c0_53 = arith.constant 0 : index
      %c0_54 = arith.constant 0 : index
      %79 = vector.load %arg6[%c0_53, %c0_54] : memref<4x32xf32, #tpu.memory_space<vmem>>, vector<4x32xf32>
      %c0_55 = arith.constant 0 : index
      %c0_56 = arith.constant 0 : index
      %80 = vector.load %arg7[%c0_55, %c0_56] : memref<4x1xf32, #tpu.memory_space<vmem>>, vector<4x1xf32>
      %81 = vector.broadcast %80 : vector<4x1xf32> to vector<4x32xf32>
      %82 = arith.mulf %79, %81 : vector<4x32xf32>
      %c0_57 = arith.constant 0 : index
      %c0_58 = arith.constant 0 : index
      %83 = vector.load %arg11[%c0_57, %c0_58] : memref<4x32xf32, #tpu.memory_space<vmem>>, vector<4x32xf32>
      %84 = vector.broadcast %78 : vector<4x1xf32> to vector<4x32xf32>
      %85 = arith.mulf %83, %84 : vector<4x32xf32>
      %86 = vector.shape_cast %72 : vector<4x1xi1> to vector<4x1xi1>
      %87 = vector.broadcast %86 : vector<4x1xi1> to vector<4x32xi1>
      %88 = arith.select %87, %85, %82 : vector<4x32xi1>, vector<4x32xf32>
      %c0_59 = arith.constant 0 : index
      %c0_60 = arith.constant 0 : index
      %c0_61 = arith.constant 0 : index
      %89 = vector.load %arg8[%c0_59, %c0_60, %c0_61] : memref<1x4x32xf32, #tpu.memory_space<vmem>>, vector<1x4x32xf32>
      %90 = vector.shape_cast %89 : vector<1x4x32xf32> to vector<4x32xf32>
      %91 = vector.shape_cast %88 : vector<4x32xf32> to vector<1x4x32xf32>
      tpu.vector_store %arg8[%c0_59, %c0_60, %c0_61], %91 {strides = array<i32>} : memref<1x4x32xf32, #tpu.memory_space<vmem>>, vector<1x4x32xf32>,
      %c0_62 = arith.constant 0 : index
      %c0_63 = arith.constant 0 : index
      %92 = vector.load %arg12[%c0_62, %c0_63] : memref<4x32xf32, #tpu.memory_space<vmem>>, vector<4x32xf32>
      %93 = vector.broadcast %78 : vector<4x1xf32> to vector<4x32xf32>
      %94 = arith.mulf %92, %93 : vector<4x32xf32>
      %cst_64 = arith.constant 0.000000e+00 : f32
      %95 = vector.shape_cast %72 : vector<4x1xi1> to vector<4x1xi1>
      %96 = vector.broadcast %95 : vector<4x1xi1> to vector<4x32xi1>
      %97 = vector.broadcast %cst_64 : f32 to vector<4x32xf32>
      %98 = arith.select %96, %94, %97 : vector<4x32xi1>, vector<4x32xf32>
      %c0_65 = arith.constant 0 : index
      %c0_66 = arith.constant 0 : index
      %c0_67 = arith.constant 0 : index
      %99 = vector.load %arg9[%c0_65, %c0_66, %c0_67] : memref<1x4x32xf32, #tpu.memory_space<vmem>>, vector<1x4x32xf32>
      %100 = vector.shape_cast %99 : vector<1x4x32xf32> to vector<4x32xf32>
      %101 = vector.shape_cast %98 : vector<4x32xf32> to vector<1x4x32xf32>
      tpu.vector_store %arg9[%c0_65, %c0_66, %c0_67], %101 {strides = array<i32>} : memref<1x4x32xf32, #tpu.memory_space<vmem>>, vector<1x4x32xf32>,
    } else {
    }
    return
  }
  func.func @transform_0(%arg0: i32, %arg1: i32) -> (i32, i32, i32) {
    %c0_i32 = arith.constant 0 : i32
    %c0_i32_0 = arith.constant 0 : i32
    return %arg0, %arg1, %c0_i32 : i32, i32, i32
  }
  func.func @transform_1(%arg0: i32, %arg1: i32) -> (i32, i32, i32) {
    %c0_i32 = arith.constant 0 : i32
    %c0_i32_0 = arith.constant 0 : i32
    return %arg0, %arg1, %c0_i32 : i32, i32, i32
  }
  func.func @transform_2(%arg0: i32, %arg1: i32) -> (i32, i32, i32) {
    %c0_i32 = arith.constant 0 : i32
    %c0_i32_0 = arith.constant 0 : i32
    return %arg0, %c0_i32, %arg1 : i32, i32, i32
  }
  func.func @transform_3(%arg0: i32, %arg1: i32) -> (i32, i32, i32) {
    %c0_i32 = arith.constant 0 : i32
    %c0_i32_0 = arith.constant 0 : i32
    return %arg0, %arg1, %c0_i32 : i32, i32, i32
  }
  func.func @transform_4(%arg0: i32, %arg1: i32) -> (i32, i32) {
    %c0_i32 = arith.constant 0 : i32
    %c0_i32_0 = arith.constant 0 : i32
    %c0_i32_1 = arith.constant 0 : i32
    return %c0_i32, %c0_i32_0 : i32, i32
  }
  func.func @transform_5(%arg0: i32, %arg1: i32) -> (i32, i32) {
    %c0_i32 = arith.constant 0 : i32
    %c0_i32_0 = arith.constant 0 : i32
    %c0_i32_1 = arith.constant 0 : i32
    return %c0_i32, %c0_i32_0 : i32, i32
  }
  func.func @transform_6(%arg0: i32, %arg1: i32) -> (i32, i32, i32) {
    %c0_i32 = arith.constant 0 : i32
    %c0_i32_0 = arith.constant 0 : i32
    %c0_i32_1 = arith.constant 0 : i32
    return %arg0, %c0_i32, %c0_i32_0 : i32, i32, i32
  }
  func.func @transform_7(%arg0: i32, %arg1: i32) -> (i32, i32, i32) {
    %c0_i32 = arith.constant 0 : i32
    %c0_i32_0 = arith.constant 0 : i32
    %c0_i32_1 = arith.constant 0 : i32
    return %arg0, %c0_i32, %c0_i32_0 : i32, i32, i32
  }
  func.func @transform_8(%arg0: i32, %arg1: i32) -> (i32, i32, i32) {
    %c0_i32 = arith.constant 0 : i32
    %c0_i32_0 = arith.constant 0 : i32
    return %arg0, %c0_i32, %arg1 : i32, i32, i32
  }
}

</mosaic_0001>

<bundles_post_ra>
// kernel: tpu_custom_call.1
= control target key start
LH: loop header
LB: loop body
LE: loop exit
PB: predicated region body
PF: predicated region fallthrough
CT: control target
= control target key end

     0   :  { %s1616_s0 = inlined_call_operand.vmem [shape: f32[2,8,32], index: 0, kind: input, shape index: {}]   ;;  %s1617_s1 = inlined_call_operand.hbm [shape: f32[2,8,32], index: 1, kind: input, shape index: {}]   ;;  %s1618_s2 = inlined_call_operand.vmem [shape: f32[2,1,8], index: 2, kind: input, shape index: {}]   ;;  %s1619_s3 = inlined_call_operand.vmem [shape: f32[2,8,1], index: 3, kind: input, shape index: {}]   ;;  %s1620_s4 = inlined_call_operand.vmem [shape: f32[4,32], index: 4, kind: input, shape index: {}]   ;;  %s1621_s5 = inlined_call_operand.vmem [shape: f32[4,1], index: 5, kind: input, shape index: {}]   ;;  %s1622_s6 = inlined_call_operand.hbm [shape: f32[2,4,32], index: 6, kind: output, shape index: {0}]   ;;  %s1623_s7 = inlined_call_operand.hbm [shape: f32[2,4,32], index: 7, kind: output, shape index: {1}]   ;;  %s1624_s8 = inlined_call_operand.hbm [shape: s32[2,1,8], index: 8, kind: output, shape index: {2}]  }
   0x1   :  { %1628 = sst [smem:[#allocation17_spill]] %s1616_s0 }
   0x2   :  { %1629 = sst [smem:[#allocation18_spill]] %s1617_s1 }
   0x3   :  { %1630 = sst [smem:[#allocation19_spill]] %s1618_s2 }
   0x4   :  { %14 = vsyncpa [#allocation6], 0 }
   0x5   :  { %16 = vsyncpa [#allocation6 + $0x1], 0 }
   0x6   :  { %17 = vsyncpa [#allocation7], 0 }
   0x7   :  { %19 = vsyncpa [#allocation7 + $0x1], 0 }
   0x8   :  { %20 = vsyncpa [#allocation10], 0 }
   0x9   :  { %22 = vsyncpa [#allocation10 + $0x1], 0  ;;  %s1337_s27 = smov 0   ;;  %s1339_s28 = smov 0  }
   0xa   :  { %s1341_s29 = smov 0   ;;  %s1343_s30 = smov 0  }
   0xb   :  { %s1345_s9 = smov 0   ;;  %s1347_s10 = smov 0  }
   0xc LB: > { %s1368_s11 = sadd.s32 4294967295, %s1283_s10   ;;  %s1626_s12 = sadd.s32 4294967294, %s1283_s10   ;;  %s1283_s10 = sphi %s1347_s10, %s28_s10   ;;  %s1279_s9 = sphi %s1345_s9, %s1651_s9   ;;  %s1275_s30 = sphi %s1343_s30, %s1650_s30   ;;  %s1271_s29 = sphi %s1341_s29, %s1649_s29   ;;  %s1267_s28 = sphi %s1339_s28, %s1648_s28   ;;  %s1263_s27 = sphi %s1337_s27, %s1647_s27  }
   0xd   : > { %s40_s13 = sadd.s32 1, %s1279_s9  ;;  %s77_s14 = sadd.s32 1, %s1271_s29 }
   0xe   : > { %p42_p0 = scmp.ge.s32.totalorder %s40_s13, 2  ;;  %p84_p1 = scmp.ne.s32.totalorder %s1271_s29, %s1267_s28 }
   0xf   : > { %p85_p2 = scmp.eq.s32.totalorder %s1283_s10, 0  ;;  %p90_p3 = scmp.ne.s32.totalorder %s1267_s28, %s1263_s27 }
  0x10   : > { %s1653_s13 = smov (%p42_p0, %s40_s13), 0  ;;  %p91_p5 = scmp.eq.s32.totalorder %s1368_s11, 0 }
  0x11   : > { %1631 = sst [smem:[#allocation15_spill]] %s1653_s13  ;;  %p1380_p4 = por %p85_p2, %p84_p1 }
  0x12   : > { %s72_s16 = ssub.s32 %s1279_s9, %s1653_s13  ;;  %p212_p6 = scmp.eq.s32.totalorder %s1368_s11, 1 }
  0x13   : > { %p75_p7 = scmp.eq.s32.totalorder %s72_s16, 0  ;;  %p1388_p8 = por %p91_p5, %p90_p3 }
  0x14   : > { %p1392_p9 = por %p212_p6, %p84_p1  ;;  %p218_p10 = scmp.eq.s32.totalorder %s1626_s12, 1 }
  0x15   : > { %s1399_s19 = scalar_select %p75_p7, %s1271_s29, %s77_s14  }
  0x16   : > { %p1401_p11 = por %p218_p10, %p90_p3  ;;  %p1062_p13 = scmp.lt.s32.totalorder %s1283_s10, 2 }
  0x17   : > { %1635 = sst [smem:[#allocation16_spill]] %s1399_s19  ;;  %s308_s21 = sand.u32 1, %s1271_s29  }
  0x18   : > { %s1636_s20 = scalar_select %p1401_p11, 1, 0 }
  0x19   : > { %s996_s22 = sshll.u32 %s308_s21, 3  ;;  %s997_s23 = sshll.u32 %s1279_s9, 7 }
  0x1a   : > { %s1637_s1 = sld [smem:[#allocation18_spill]]  ;;  %s312_s16 = scalar_lea.vmem [#allocation5], %s996_s22 }
  0x1b   : > { %s320_s13 = sshll.u32 %s312_s16, 4  ;;  %p1414_p0 = pnand %p1062_p13, %p1380_p4  ;;  %s321_s13 = int_to_ptr.vmem [resolvable:$true] %s320_s13 }
  0x1c   : > { %p998_p1 = scmp.ge.s32.totalorder %s1283_s10, 1  ;;  %p344_p2 = scmp.lt.s32.totalorder %s1283_s10, 3 }
  0x1d   : > { %s309_s12 = scalar_lea.sflag [#allocation6], %s308_s21  ;;  %p1121_p3 = pneg %p1414_p0 }
  0x1e   : > { %s1132_s19 = scalar_lea.vmem %s321_s13, 128  ;;  %s1285_s24 = smov [#allocation5]  }
  0x1f   : > { %p1133_p5 = scmp.ne.s32.totalorder %s321_s13, %s1132_s19 }
  0x20   : > { %s318_s26 = scalar_lea.hbm %s1637_s1, %s997_s23  ;;  %s1137_s23 = sshll.u32 %s1285_s24, 4  ;;  %s1138_s23 = int_to_ptr.vmem [resolvable:$false] %s1137_s23 }
  0x21   : > { %p1135_p6 = pnand %p1133_p5, %p1121_p3  ;;  %s1139_s22 = scalar_lea.vmem %s1138_s23, 256 }
  0x22   : > { %p1140_p10 = scmp.lt.s32.totalorder %s321_s13, %s1138_s23  ;;  %p1141_p12 = scmp.lt.s32.totalorder %s1139_s22, %s1132_s19 }
  0x23   : > { %p1136_p7 = pneg %p1135_p6 }
  0x24   : > { %p1142_p4 = por %p1141_p12, %p1140_p10 }
  0x26   : > { %p1143_p13 = pnand %p1142_p4, %p1136_p7 }
  0x28   : > { %1146 = shalt.err (!%p1143_p13)
}
  0x29   : > { %1051 = dma.hbm_to_vmem [thread:$0]  (!%p1414_p0), %s318_s26, 128, %s321_s13, %s309_s12  }
  0x2a   : > { %p345_p11 = pnand %p998_p1, %p344_p2 }
  0x2b   : > { %s1429_s15 = sand.u32 (!%p345_p11), 1, %s1267_s28  }
  0x2c   : > { %348 = sbr.rel (%p345_p11) target bundleno = 774 (0x306), region = 44  ;;  %s999_s21 = sshll.u32 (!%p345_p11), %s1429_s15, 3 }
  0x2d   : > { %s351_s19 = scalar_lea.sflag (!%p345_p11), [#allocation6], %s1429_s15  ;;  %s1433_s25 = scalar_lea.vmem (!%p345_p11), [#allocation5], %s999_s21 }
  0x31   : > { %1250 = dma.done.wait (%p1388_p8), %s351_s19, 128  }
  0x32   : > { %1252 = vsyncadd (%p1388_p8), %s351_s19, 4294967168  ;;  %p416_p12 = scmp.lt.s32.totalorder %s1275_s30, 1  ;;  %v1286_v0 = vmov 0   ;;  %v1287_v1 = vmov 0.0   ;;  %vm1288_vm1 = vmmov 0   ;;  %s1639_s0 = sld [smem:[#allocation17_spill]]  ;;  %v536_v12 = vlaneseq }
  0x33   : > { %1115 = vset.pattern.permute.xlu0 %v1286_v0  ;;  %1116 = vset.pattern.permute.xlu1 %v1286_v0  ;;  %vm459_vm2 = vcmask 261120   ;;  %v445_v7 = vld [vmem:[%s1620_s4] sm:$0xf]  ;;  %vm443_vm4 = vcmask 3072   ;;  %vm538_vm5 = vcmask 60416   ;;  %s1640_s2 = sld [smem:[#allocation19_spill]] }
  0x34   : > { %s1443_s12 = scalar_select %p416_p12, %s1275_s30, 1  ;;  %1028 = vmatprep.subr.mxu1 %v1287_v1  ;;  %1023 = vmatprep.subr.mxu0 %v1287_v1  ;;  %444 = vst.msk [vmem:[#allocation4] sm:$0xf] %vm443_vm4, %v1287_v1  ;;  %v537_v15 = vshrl.u32 %v536_v12, 7  ;;  %vm558_vm9 = vcmask 57344   ;;  %vm569_vm11 = vcmask 64512  }
  0x35   : > { %1025 = vmatprep.mubr.msk.f32.mxu0 %vm1288_vm1, %v1287_v1  ;;  %1030 = vmatprep.mubr.msk.f32.mxu1 %vm1288_vm1, %v1287_v1  ;;  %v447_v35 = vld [vmem:[%s1433_s25] sm:$0xff]  ;;  %v738_v38 = vld [vmem:[%s1621_s5] sm:$0xf]  ;;  %vm440_vm13 = vcmask 257024   ;;  %s1000_s25 = sshll.u32 %s1429_s15, 2  ;;  %s768_s17 = sand.u32 1, %s1368_s11  }
  0x36   : > { %s1002_s13 = sshll.u32 %s1443_s12, 3  ;;  %v547_v18 = vcvt.s32.f32 %v537_v15  ;;  %v564_v27 = vsub.s32 0, %v537_v15  ;;  %741 = vperm.xlu1 %1116, %v738_v38   ;;  %441 = vst.msk [vmem:[#allocation2] sm:$0xf] %vm440_vm13, %v1287_v1  ;;  %442 = vst.msk [vmem:[#allocation3] sm:$0xf] %vm440_vm13, %v1287_v1 }
  0x37   : > { %s435_s14 = scalar_lea.vmem %s1619_s3, %s1002_s13  ;;  %s1012_s24 = sshll.u32 %s1275_s30, 6  ;;  %v737_v57 = vld [vmem:[%s1620_s4] sm:$0xf] }
  0x38   : > { %v450_v2 = vld [vmem:[%s435_s14] sm:$0xff]  ;;  %s422_s23 = scalar_lea.vmem %s1639_s0, %s1002_s13  ;;  %s409_s21 = scalar_lea.vmem [#allocation9], %s1000_s25 }
  0x39   : > { %vm451_vm0 = vcmp.gt.f32.partialorder %v450_v2, 0.0  ;;  %v446_v4 = vld [vmem:[%s422_s23] sm:$0xff]  ;;  %s428_s26 = scalar_lea.vmem %s1640_s2, %s1443_s12  ;;  %s1627_s12 = scalar_lea.vmem [#allocation11], %s1429_s15 }
  0x3a   : > { %v452_v3 = vsel %vm451_vm0, 1, %v1286_v0  ;;  %v448_v23 = vld [vmem:[%s428_s26] sm:$0x1]  ;;  %s799_s19 = sshll.u32 %s409_s21, 4  ;;  %s1503_s16 = scalar_lea.hbm %s1623_s7, %s1012_s24  ;;  %s1508_s19 = int_to_ptr.vmem [resolvable:$true] %s799_s19 }
  0x3b   : > { %454 = vperm.xlu0 %1115, %v452_v3   ;;  %vm449_vm7 = vcmp.gt.f32.partialorder %v448_v23, 0.0  ;;  %v724_v39 = vld [vmem:[#allocation4] sm:$0xf]  ;;  %s402_s14 = scalar_lea.vmem [#allocation8], %s1000_s25  ;;  %s1014_s11 = sshll.u32 %s1275_s30, 4 }
  0x3c   : > { %v561_v28 = vsel %vm449_vm7, 1, %v1286_v0  ;;  %s1641_s0 = scalar_lea.vmem [#allocation11], %s1429_s15  ;;  %s1513_s25 = scalar_lea.hbm %s1622_s6, %s1012_s24 }
  0x3d   : > { %v565_v31 = vrot.slane %v561_v28, %v564_v27  ;;  %v717_v47 = vld [vmem:[#allocation2] sm:$0xf]  ;;  %v721_v51 = vld [vmem:[#allocation3] sm:$0xf]  ;;  %s813_s23 = sshll.u32 %s1641_s0, 4  ;;  %s1522_s26 = scalar_lea.hbm %s1624_s8, %s1014_s11  ;;  %s1524_s23 = int_to_ptr.vmem [resolvable:$true] %s813_s23 }
  0x3e   : > { %s1526_s1 = scalar_lea.sflag [#allocation10], %s768_s17  ;;  %s1147_s2 = scalar_lea.vmem %s1508_s19, 64 }
  0x3f   : > { %vm566_vm8 = vcmp.eq.s32.totalorder %v565_v31, 1  ;;  %p1148_p8 = scmp.ne.s32.totalorder %s1508_s19, %s1147_s2  ;;  %s1289_s24 = smov [#allocation9]  }
  0x40   : > { %s1151_s22 = sshll.u32 %s1289_s24, 4  ;;  %s1152_s22 = int_to_ptr.vmem [resolvable:$false] %s1151_s22 }
  0x41   : > { %p1149_p11 = pnand %p1148_p8, %p1392_p9  ;;  %p1154_p1 = scmp.lt.s32.totalorder %s1508_s19, %s1152_s22 }
  0x43   : > { %p1150_p0 = pneg %p1149_p11 }
  0xb1   : > { %v742_v55 = vpop.permute.xlu1 %741 }
  0xb2   : > { %v744_v60 = vmul.f32 %v742_v55, %v737_v57 }
  0xb6   : > { %v455_v5 = vpop.permute.xlu0 %454 }
  0xb7   : > { %vm456_vm3 = vcmp.eq.s32.totalorder %v455_v5, 1 }
  0xb8   : > { %1029 = vmatpush3.msk.msra.mxu1 %vm456_vm3, %v446_v4  ;;  %v457_v6 = vsel %vm456_vm3, %v446_v4, 0.0 }
  0xb9   : > { %1024 = vmatpush3.xpose.msk.msra.mxu0 %vm459_vm2, %v457_v6  ;;  %1033 = vmatprep.subr.mxu1 %v1287_v1 }
  0xbc   : > { %1026 = vmatmul.mubr.msk.f32.vlgmr.msra.gmra.mxu0 %vm459_vm2, %v445_v7 }
 0x17c   : > { %v532_v8 = vpop.f32.mrf.mxu0 }
 0x17d   : > { %v539_v9 = vsel %vm538_vm5, %v532_v8, -inf }
 0x17e   : > { %v540_v10 = vrot.slane %v539_v9, 4  ;;  %v1027_v11 = vpop.f32.mrf.mxu0 }
 0x180   : > { %v541_v13 = vmax.f32 %v539_v9, %v540_v10 }
 0x182   : > { %v542_v14 = vrot.slane %v541_v13, 2 }
 0x184   : > { %v543_v16 = vmax.f32 %v541_v13, %v542_v14 }
 0x186   : > { %v544_v17 = vrot.slane %v543_v16, 1 }
 0x188   : > { %v545_v19 = vmax.f32 %v543_v16, %v544_v17 }
 0x18a   : > { %vm546_vm6 = vcmp.eq.f32.partialorder %v532_v8, %v545_v19 }
 0x18b   : > { %v548_v20 = vsel %vm546_vm6, %v547_v18, 4.0 }
 0x18c   : > { %v549_v21 = vsel %vm538_vm5, %v548_v20, inf }
 0x18d   : > { %v550_v22 = vrot.slane %v549_v21, 4 }
 0x18f   : > { %v551_v24 = vmin.f32 %v549_v21, %v550_v22 }
 0x191   : > { %v552_v25 = vrot.slane %v551_v24, 2 }
 0x193   : > { %v553_v26 = vmin.f32 %v551_v24, %v552_v25 }
 0x195   : > { %v554_v29 = vrot.slane %v553_v26, 1 }
 0x197   : > { %v555_v30 = vmin.f32 %v553_v26, %v554_v29 }
 0x199   : > { %v1038_v32 = vtrunc.f32 %v555_v30 }
 0x19b   : > { %v1039_v33 = vcvt.f32.s32 %v1038_v32 }
 0x19d   : > { %v557_v34 = vsel %vm449_vm7, %v1039_v33, 0  ;;  %vm560_vm10 = vcmp.eq.s32.totalorder %v1039_v33, %v537_v15 }
 0x19e   : > { %vm567_vm12 = vmand %vm560_vm10, %vm566_vm8  ;;  %559 = vst.msk [vmem:[%s1627_s12] sm:$0x1] %vm558_vm9, %v557_v34  ;;  %s786_s12 = sshll.u32 %s402_s14, 4  ;;  %s1515_s12 = int_to_ptr.vmem [resolvable:$true] %s786_s12 }
 0x19f   : > { %v568_v36 = vsel %vm567_vm12, 1.0, %v1287_v1 }
 0x1a0   : > { %1031 = vmatmul.mubr.msk.f32.vlgmr.msra.gmra.mxu1 %vm569_vm11, %v568_v36  ;;  %v713_v37 = vsel %vm538_vm5, %v568_v36, 0.0 }
 0x1a1   : > { %1034 = vmatpush3.msk.msra.mxu1 %vm456_vm3, %v447_v35  ;;  %714 = vadd.xlane.f32.xlu0 %v713_v37 }
 0x1a2   : > { %1035 = vmatprep.mubr.msk.f32.mxu1 %vm1288_vm1, %v1287_v1 }
 0x1a4   : > { %1036 = vmatmul.mubr.msk.f32.vlgmr.msra.gmra.mxu1 %vm569_vm11, %v568_v36 }
 0x22a   : > { %v715_v40 = vpop.xlane.xlu0 %714 }
 0x22b   : > { %v725_v41 = vadd.f32 %v724_v39, %v715_v40 }
 0x22d   : > { %727 = vst.msk [vmem:[#allocation4] sm:$0xf] %vm443_vm4, %v725_v41 }
 0x234   : > { %v731_v42 = vld [vmem:[#allocation4] sm:$0xf] }
 0x235   : > { %v733_v43 = vmax.f32 %v731_v42, 1.0  ;;  %vm732_vm14 = vcmp.gt.f32.partialorder %v731_v42, 0.0 }
 0x236   : > { %v752_v46 = vsel %vm732_vm14, 1, %v1286_v0 }
 0x237   : > { %1117 = vrcp.f32 %v733_v43 }
 0x244   : > { %v1118_v44 = vpop.eup %1117 }
 0x245   : > { %v736_v45 = vsel %vm732_vm14, %v1118_v44, 0.0 }
 0x246   : > { %748 = vperm.xlu1 %1116, %v736_v45  }
 0x24a   : > { %754 = vperm.xlu1 %1116, %v752_v46  }
 0x260   : > { %v639_v48 = vpop.f32.mrf.mxu1 }
 0x261   : > { %v718_v49 = vadd.f32 %v717_v47, %v639_v48 }
 0x262   : > { %v1032_v50 = vpop.f32.mrf.mxu1 }
 0x263   : > { %720 = vst.msk [vmem:[#allocation2] sm:$0xf] %vm440_vm13, %v718_v49 }
 0x264   : > { %v709_v52 = vpop.f32.mrf.mxu1 }
 0x265   : > { %v722_v53 = vadd.f32 %v721_v51, %v709_v52 }
 0x266   : > { %v1037_v54 = vpop.f32.mrf.mxu1 }
 0x267   : > { %723 = vst.msk [vmem:[#allocation3] sm:$0xf] %vm440_vm13, %v722_v53 }
 0x26a   : > { %v745_v58 = vld [vmem:[#allocation2] sm:$0xf] }
 0x26e   : > { %v759_v59 = vld [vmem:[#allocation3] sm:$0xf] }
 0x2c1   : > { %v749_v56 = vpop.permute.xlu1 %748 }
 0x2c2   : > { %v751_v61 = vmul.f32 %v749_v56, %v745_v58  ;;  %v760_v62 = vmul.f32 %v759_v59, %v749_v56 }
 0x2c5   : > { %v755_v63 = vpop.permute.xlu1 %754 }
 0x2c6   : > { %vm756_vm15 = vcmp.eq.s32.totalorder %v755_v63, 1 }
 0x2c7   : > { %v757_v0 = vsel %vm756_vm15, %v751_v61, %v744_v60  ;;  %v761_v1 = vsel %vm756_vm15, %v760_v62, 0.0 }
 0x2c8   : > { %762 = vst.msk [vmem:[%s409_s21] sm:$0xf] %vm440_vm13, %v761_v1  ;;  %758 = vst.msk [vmem:[%s402_s14] sm:$0xf] %vm440_vm13, %v757_v0  ;;  %s1153_s21 = scalar_lea.vmem %s1152_s22, 128 }
 0x2c9   : > { %p1155_p2 = scmp.lt.s32.totalorder %s1153_s21, %s1147_s2 }
 0x2cb   : > { %p1156_p3 = por %p1155_p2, %p1154_p1 }
 0x2cd   : > { %p1157_p5 = pnand %p1156_p3, %p1150_p0 }
 0x2cf   : > { %1160 = shalt.err (!%p1157_p5)
}
 0x2d0   : > { %s1161_s17 = scalar_lea.hbm %s1503_s16, 64  ;;  %s1165_s13 = scalar_lea.hbm %s1623_s7, 128 }
 0x2d1   : > { %p1162_p6 = scmp.ne.s32.totalorder %s1503_s16, %s1161_s17  ;;  %p1166_p4 = scmp.lt.s32.totalorder %s1503_s16, %s1623_s7 }
 0x2d2   : > { %p1167_p13 = scmp.lt.s32.totalorder %s1165_s13, %s1161_s17 }
 0x2d3   : > { %p1163_p7 = pnand %p1162_p6, %p1392_p9 }
 0x2d4   : > { %p1168_p12 = por %p1167_p13, %p1166_p4 }
 0x2d5   : > { %p1164_p10 = pneg %p1163_p7 }
 0x2d7   : > { %p1169_p8 = pnand %p1168_p12, %p1164_p10 }
 0x2d9   : > { %1172 = shalt.err (!%p1169_p8)
}
 0x2da   : > { %1043 = dma.vmem_to_hbm [thread:$0]  (%p1392_p9), %s1508_s19, 64, %s1503_s16, %s1526_s1  }
 0x2db   : > { %s764_s2 = scalar_lea.sflag [#allocation7], %s1429_s15  ;;  %s1173_s24 = scalar_lea.vmem %s1515_s12, 64 }
 0x2dc   : > { %p1174_p11 = scmp.ne.s32.totalorder %s1515_s12, %s1173_s24  ;;  %s1290_s22 = smov [#allocation8]  }
 0x2dd   : > { %s1177_s21 = sshll.u32 %s1290_s22, 4  ;;  %s1178_s21 = int_to_ptr.vmem [resolvable:$false] %s1177_s21 }
 0x2de   : > { %p1175_p0 = pnand %p1174_p11, %p1392_p9  ;;  %s1179_s17 = scalar_lea.vmem %s1178_s21, 128 }
 0x2df   : > { %p1180_p2 = scmp.lt.s32.totalorder %s1515_s12, %s1178_s21  ;;  %p1181_p3 = scmp.lt.s32.totalorder %s1179_s17, %s1173_s24 }
 0x2e0   : > { %p1176_p1 = pneg %p1175_p0 }
 0x2e1   : > { %p1182_p5 = por %p1181_p3, %p1180_p2 }
 0x2e3   : > { %p1183_p6 = pnand %p1182_p5, %p1176_p1 }
 0x2e5   : > { %1186 = shalt.err (!%p1183_p6)
}
 0x2e6   : > { %s1187_s19 = scalar_lea.hbm %s1513_s25, 64  ;;  %s1191_s14 = scalar_lea.hbm %s1622_s6, 128 }
 0x2e7   : > { %p1188_p7 = scmp.ne.s32.totalorder %s1513_s25, %s1187_s19  ;;  %p1192_p13 = scmp.lt.s32.totalorder %s1513_s25, %s1622_s6 }
 0x2e8   : > { %p1193_p12 = scmp.lt.s32.totalorder %s1191_s14, %s1187_s19 }
 0x2e9   : > { %p1189_p10 = pnand %p1188_p7, %p1392_p9 }
 0x2ea   : > { %p1194_p8 = por %p1193_p12, %p1192_p13 }
 0x2eb   : > { %p1190_p4 = pneg %p1189_p10 }
 0x2ed   : > { %p1195_p11 = pnand %p1194_p8, %p1190_p4 }
 0x2ef   : > { %1198 = shalt.err (!%p1195_p11)
}
 0x2f0   : > { %1042 = dma.vmem_to_hbm [thread:$0]  (%p1392_p9), %s1515_s12, 64, %s1513_s25, %s764_s2  }
 0x2f1   : > { %s1199_s0 = scalar_lea.vmem %s1524_s23, 16  ;;  %s1291_s30 = smov [#allocation11]  }
 0x2f2   : > { %p1200_p0 = scmp.ne.s32.totalorder %s1524_s23, %s1199_s0  ;;  %s1203_s24 = sshll.u32 %s1291_s30, 4  ;;  %s1204_s24 = int_to_ptr.vmem [resolvable:$false] %s1203_s24 }
 0x2f3   : > { %s1205_s22 = scalar_lea.vmem %s1204_s24, 32  ;;  %p1206_p3 = scmp.lt.s32.totalorder %s1524_s23, %s1204_s24 }
 0x2f4   : > { %p1201_p1 = pnand %p1200_p0, %p1392_p9  ;;  %p1207_p5 = scmp.lt.s32.totalorder %s1205_s22, %s1199_s0 }
 0x2f6   : > { %p1202_p2 = pneg %p1201_p1  ;;  %p1208_p6 = por %p1207_p5, %p1206_p3 }
 0x2f8   : > { %p1209_p7 = pnand %p1208_p6, %p1202_p2 }
 0x2fa   : > { %1212 = shalt.err (!%p1209_p7)
}
 0x2fb   : > { %s1213_s21 = scalar_lea.hbm %s1522_s26, 16  ;;  %s1217_s2 = scalar_lea.hbm %s1624_s8, 32 }
 0x2fc   : > { %p1214_p10 = scmp.ne.s32.totalorder %s1522_s26, %s1213_s21  ;;  %p1218_p12 = scmp.lt.s32.totalorder %s1522_s26, %s1624_s8 }
 0x2fd   : > { %p1219_p8 = scmp.lt.s32.totalorder %s1217_s2, %s1213_s21 }
 0x2fe   : > { %p1215_p4 = pnand %p1214_p10, %p1392_p9 }
 0x2ff   : > { %p1220_p11 = por %p1219_p8, %p1218_p12 }
 0x300   : > { %p1216_p13 = pneg %p1215_p4 }
 0x302   : > { %p1221_p0 = pnand %p1220_p11, %p1216_p13 }
 0x304   : > { %1224 = shalt.err (!%p1221_p0)
}
 0x305   : > { %1044 = dma.vmem_to_hbm [thread:$0]  (%p1392_p9), %s1524_s23, 16, %s1522_s26, %s1526_s1  }
 0x306 PF: > { %s825_s15 = sand.u32 1, %s1263_s27   ;;  %p1642_p1 = scmp.ne.s32.totalorder %s1636_s20, 0 }
 0x307   : > { %p1643_p2 = scmp.ge.s32.totalorder %s1283_s10, 2  ;;  %s826_s16 = scalar_lea.sflag [#allocation7], %s825_s15 }
 0x309   : > { %p1053_p3 = pnand %p1643_p2, %p1642_p1 }
 0x30b   : > { %p1054_p5 = pneg %p1053_p3 }
 0x30d   : > { %1254 = dma.done.wait (%p1054_p5), %s826_s16, 64  }
 0x30e   : > { %1256 = vsyncadd (%p1054_p5), %s826_s16, 4294967232  ;;  %s1644_s14 = sadd.s32 4294967294, %s1283_s10  }
 0x30f   : > { %s834_s11 = sand.u32 1, %s1644_s14  }
 0x310   : > { %s835_s18 = scalar_lea.sflag [#allocation10], %s834_s11 }
 0x311   : > { %1258 = dma.done.wait (%p1054_p5), %s835_s18, 80  }
 0x312   : > { %1260 = vsyncadd (%p1054_p5), %s835_s18, 4294967216  ;;  %s28_s10 = sadd.s32 1, %s1283_s10   ;;  %s1645_s1 = sld [smem:[#allocation16_spill]] }
 0x313   : > { %p25_p9 = scmp.ge.s32.totalorder %s28_s10, 4   ;;  %s1646_s20 = sld [smem:[#allocation15_spill]] }
 0x314   : > { %s1647_s27 = smov %s1267_s28  ;;  %s1648_s28 = smov %s1271_s29 }
 0x315   : > { %s1650_s30 = smov %s1279_s9  ;;  %27 = sbr.rel (!%p25_p9) target bundleno = 12 (0xc), region = 138 }
 0x318   : > { %s1649_s29 = smov %s1645_s1 }
 0x319   : > { %s1651_s9 = smov %s1646_s20 }
 0x31a   :  { %848 = vsyncpa [#allocation6], 1 }
 0x31b   :  { %850 = vsyncpa [#allocation6 + $0x1], 1 }
 0x31c   :  { %851 = vsyncpa [#allocation7], 1 }
 0x31d   :  { %853 = vsyncpa [#allocation7 + $0x1], 1 }
 0x31e   :  { %854 = vsyncpa [#allocation10], 1 }
 0x31f   :  { %856 = vsyncpa [#allocation10 + $0x1], 1 }

</bundles_post_ra>
